<compile_context>
chip_gen: v6e
topology: v6e:2x2x1
jax: 0.10.0
libtpu: 0.0.40
codegen_flags: <defaults>
</compile_context>

<pallas_src>
import functools

import jax
import jax.numpy as jnp
from jax.experimental import pallas as pl
from jax.experimental.pallas import tpu as pltpu


def _round_up(n, m):
    return ((n + m - 1) // m) * m


def mlp_logsoftmax_kernel(x_ref, w1_ref, b1_ref, w2_ref, b2_ref, o_ref):
    """Per grid step:
      x_ref  : (TB, d_in)        input rows (f32, or bf16 if bf16 params)
      w1_ref : (d_in, 128)       hidden dim zero-padded 50 -> 128 (resident)
      b1_ref : (1, 128)          f32
      w2_ref : (128, 128)        output dim padded 10 -> 128 (zero weight cols)
      b2_ref : (1, 128)          padded cols hold a finite -1e30 bias
      o_ref  : (16, TB)          log-probs, transposed + narrow (16 >= d_out)
    """
    x = x_ref[...]
    # MXU matmul #1 (f32 accumulate), VPU bias + ReLU.
    h = jnp.dot(x, w1_ref[...], preferred_element_type=jnp.float32)
    h = jnp.maximum(h + b1_ref[...], 0.0)
    # MXU matmul #2.
    logits = jnp.dot(h.astype(w2_ref.dtype), w2_ref[...],
                     preferred_element_type=jnp.float32)
    logits = logits + b2_ref[...]            # padded cols -> ~-1e30 (finite)
    # Numerically stable log_softmax along lanes.  Padded columns carry a
    # large-negative *finite* logit: exp underflows to 0, so the real columns'
    # result is identical to the unpadded computation (no inf-inf NaN).
    m = jnp.max(logits, axis=-1, keepdims=True)
    shifted = logits - m
    lse = jnp.log(jnp.sum(jnp.exp(shifted), axis=-1, keepdims=True))
    ls = shifted - lse                       # (TB, 128) f32
    # Transpose so lanes carry the batch (TB is 128-multiple when grid>1 ->
    # unmasked vst) and write only 16 sublanes: ~8x less HBM writeback than a
    # 128-wide padded store.  The XLU transpose sits in slack.
    ls_t = ls.T                              # (128, TB)
    o_ref[...] = ls_t[: o_ref.shape[0], :].astype(o_ref.dtype)


def prepare_params(w1, b1, w2, b2, *, mxu_dtype=jnp.float32):
    """Pad/cast the weights ONCE at parameter setup (hoisted out of the
    per-call hot path).

    w1: (d_in, d_hid), b1: (d_hid,), w2: (d_hid, d_out), b2: (d_out,)
    (weights already transposed relative to torch's nn.Linear (out, in)).
    """
    d_in, d_hid = w1.shape
    d_out = w2.shape[1]
    d_hid_p = _round_up(d_hid, 128)
    d_out_p = _round_up(d_out, 128)

    w1_p = (jnp.zeros((d_in, d_hid_p), jnp.float32)
            .at[:, :d_hid].set(w1).astype(mxu_dtype))
    b1_p = jnp.zeros((1, d_hid_p), jnp.float32).at[0, :d_hid].set(b1)
    w2_p = (jnp.zeros((d_hid_p, d_out_p), jnp.float32)
            .at[:d_hid, :d_out].set(w2).astype(mxu_dtype))
    # Finite large-negative pad (NOT -inf) so shifted = pad - max never NaNs.
    b2_p = jnp.full((1, d_out_p), -1e30, jnp.float32).at[0, :d_out].set(b2)
    return {"w1": w1_p, "b1": b1_p, "w2": w2_p, "b2": b2_p}


def simple_model_forward(x, params, *, d_out, tb=1024):
    """x: (B, C, H, W) float32 (NCHW, like PyTorch). Returns (B, d_out) f32."""
    w1, b1, w2, b2 = params["w1"], params["b1"], params["w2"], params["b2"]
    B = x.shape[0]
    x_flat = x.reshape(B, -1).astype(w1.dtype)      # == torch.flatten(x, 1)
    d_in = x_flat.shape[1]
    d_hid_p = w1.shape[1]
    d_out_p = w2.shape[1]
    d_out_s = _round_up(d_out, 8)                   # narrow transposed-output rows

    # ---- batch tiling ----
    # Small batch: a single tile (grid=1), rounded to 8 sublanes.
    # Larger batch: tiles that are a multiple of 128 (keeps the transposed
    # output store lane-dense) split so the "parallel" axis has >= 2 steps
    # (megacore sharding on v7x), capped at tb rows.
    B8 = _round_up(B, 8)
    if B8 <= 256:
        TB = B8
    else:
        TB = max(128, min(tb, _round_up(pl.cdiv(B, 2), 128)))
    B_pad = _round_up(B, TB)
    if B_pad != B:
        x_flat = jnp.pad(x_flat, ((0, B_pad - B), (0, 0)))   # fusable, no big copy
    grid = (B_pad // TB,)

    out_t = pl.pallas_call(
        mlp_logsoftmax_kernel,
        out_shape=jax.ShapeDtypeStruct((d_out_s, B_pad), jnp.float32),
        grid_spec=pl.GridSpec(
            grid=grid,
            in_specs=[
                pl.BlockSpec((TB, d_in), lambda i: (i, 0)),        # x tile streams
                pl.BlockSpec((d_in, d_hid_p), lambda i: (0, 0)),   # weights resident
                pl.BlockSpec((1, d_hid_p), lambda i: (0, 0)),
                pl.BlockSpec((d_hid_p, d_out_p), lambda i: (0, 0)),
                pl.BlockSpec((1, d_out_p), lambda i: (0, 0)),
            ],
            out_specs=pl.BlockSpec((d_out_s, TB), lambda i: (0, i)),
        ),
        compiler_params=pltpu.CompilerParams(
            dimension_semantics=("parallel",)),   # megacore-shardable on v7x
    )(x_flat, w1, b1, w2, b2)

    # (16, B_pad) -> (B, d_out): tiny slice+transpose, kept under the same jit.
    return out_t[:d_out, :B].T


def reference_forward(x, w1, b1, w2, b2):
    """Plain-JAX reference matching the PyTorch module."""
    B = x.shape[0]
    xf = x.reshape(B, -1)
    h = jnp.maximum(xf @ w1 + b1, 0.0)
    logits = h @ w2 + b2
    return jax.nn.log_softmax(logits, axis=1)


if __name__ == "__main__":
    key = jax.random.PRNGKey(0)
    k_x, k_w1, k_b1, k_w2, k_b2 = jax.random.split(key, 5)

    # Small shapes consistent with the module: input_size = 4*4*2 = 32, output = 10.
    B, C, H, W = 2, 4, 4, 2
    input_size = C * H * W          # 32
    hidden = 50
    output_size = 10

    x = jax.random.normal(k_x, (B, C, H, W), dtype=jnp.float32)

    # Deterministic init mimicking nn.Linear's uniform(-1/sqrt(fan_in), 1/sqrt(fan_in)).
    lim1 = 1.0 / (input_size ** 0.5)
    lim2 = 1.0 / (hidden ** 0.5)
    w1 = jax.random.uniform(k_w1, (input_size, hidden), jnp.float32, -lim1, lim1)
    b1 = jax.random.uniform(k_b1, (hidden,), jnp.float32, -lim1, lim1)
    w2 = jax.random.uniform(k_w2, (hidden, output_size), jnp.float32, -lim2, lim2)
    b2 = jax.random.uniform(k_b2, (output_size,), jnp.float32, -lim2, lim2)

    # Pad/cast parameters once at setup (out of the per-call hot path).
    # Use mxu_dtype=jnp.bfloat16 to halve weight+activation streams (loosen the
    # tolerance to ~1e-2 in that case); f32 here keeps the 1e-5 check tight.
    params = prepare_params(w1, b1, w2, b2, mxu_dtype=jnp.float32)

    fwd = jax.jit(functools.partial(simple_model_forward, d_out=output_size))
    out = jax.block_until_ready(fwd(x, params))

    ref = reference_forward(x, w1, b1, w2, b2)
    assert out.shape == (B, output_size)
    assert jnp.allclose(out, ref, atol=1e-5, rtol=1e-5), "mismatch vs reference"

    print("KERNEL_OK")
</pallas_src>

<mosaic_0001>
module attributes {stable_mosaic.version = 11 : i64} {
  func.func @mlp_logsoftmax_kernel(%arg0: i32, %arg1: memref<8x32xf32, #tpu.memory_space<vmem>>, %arg2: memref<32x128xf32, #tpu.memory_space<vmem>>, %arg3: memref<1x128xf32, #tpu.memory_space<vmem>>, %arg4: memref<128x128xf32, #tpu.memory_space<vmem>>, %arg5: memref<1x128xf32, #tpu.memory_space<vmem>>, %arg6: memref<16x8xf32, #tpu.memory_space<vmem>>) attributes {dimension_semantics = [#tpu.dimension_semantics<parallel>], iteration_bounds = array<i64: 1>, scalar_prefetch = 0 : i64, scratch_operands = 0 : i64, tpu.core_type = #tpu.core_type<tc>, window_params = [{transform_indices = @transform_0, window_bounds = array<i64: 8, 32>}, {pipeline_mode = #tpu.pipeline_mode<synchronous>, transform_indices = @transform_1, window_bounds = array<i64: 32, 128>}, {pipeline_mode = #tpu.pipeline_mode<synchronous>, transform_indices = @transform_2, window_bounds = array<i64: 1, 128>}, {pipeline_mode = #tpu.pipeline_mode<synchronous>, transform_indices = @transform_3, window_bounds = array<i64: 128, 128>}, {pipeline_mode = #tpu.pipeline_mode<synchronous>, transform_indices = @transform_4, window_bounds = array<i64: 1, 128>}, {transform_indices = @transform_5, window_bounds = array<i64: 16, 8>}]} {
    %c0 = arith.constant 0 : index
    %c0_0 = arith.constant 0 : index
    %0 = vector.load %arg1[%c0, %c0_0] : memref<8x32xf32, #tpu.memory_space<vmem>>, vector<8x32xf32>
    %c0_1 = arith.constant 0 : index
    %c0_2 = arith.constant 0 : index
    %1 = vector.load %arg2[%c0_1, %c0_2] : memref<32x128xf32, #tpu.memory_space<vmem>>, vector<32x128xf32>
    %cst = arith.constant dense<0.000000e+00> : vector<8x128xf32>
    %2 = tpu.matmul %0, %1, %cst {dimension_numbers = #tpu.dot_dimension_numbers<[1], [0], [0], [1], [0, 0, 1, 1], [], []>} : vector<8x32xf32>, vector<32x128xf32>, vector<8x128xf32> -> vector<8x128xf32>
    %c0_3 = arith.constant 0 : index
    %c0_4 = arith.constant 0 : index
    %3 = vector.load %arg3[%c0_3, %c0_4] : memref<1x128xf32, #tpu.memory_space<vmem>>, vector<1x128xf32>
    %4 = vector.broadcast %3 : vector<1x128xf32> to vector<8x128xf32>
    %5 = arith.addf %2, %4 : vector<8x128xf32>
    %cst_5 = arith.constant 0.000000e+00 : f32
    %6 = vector.broadcast %cst_5 : f32 to vector<8x128xf32>
    %7 = arith.maximumf %5, %6 : vector<8x128xf32>
    %c0_6 = arith.constant 0 : index
    %c0_7 = arith.constant 0 : index
    %8 = vector.load %arg4[%c0_6, %c0_7] : memref<128x128xf32, #tpu.memory_space<vmem>>, vector<128x128xf32>
    %cst_8 = arith.constant dense<0.000000e+00> : vector<8x128xf32>
    %9 = tpu.matmul %7, %8, %cst_8 {dimension_numbers = #tpu.dot_dimension_numbers<[1], [0], [0], [1], [0, 0, 1, 1], [], []>} : vector<8x128xf32>, vector<128x128xf32>, vector<8x128xf32> -> vector<8x128xf32>
    %c0_9 = arith.constant 0 : index
    %c0_10 = arith.constant 0 : index
    %10 = vector.load %arg5[%c0_9, %c0_10] : memref<1x128xf32, #tpu.memory_space<vmem>>, vector<1x128xf32>
    %11 = vector.broadcast %10 : vector<1x128xf32> to vector<8x128xf32>
    %12 = arith.addf %9, %11 : vector<8x128xf32>
    %cst_11 = arith.constant dense<0xFF800000> : vector<8xf32>
    %13 = vector.multi_reduction <maximumf>, %12, %cst_11 [1] : vector<8x128xf32> to vector<8xf32>
    %14 = vector.shape_cast %13 : vector<8xf32> to vector<8x1xf32>
    %15 = vector.broadcast %14 : vector<8x1xf32> to vector<8x128xf32>
    %16 = arith.subf %12, %15 : vector<8x128xf32>
    %17 = math.exp %16 : vector<8x128xf32>
    %cst_12 = arith.constant dense<0.000000e+00> : vector<8xf32>
    %18 = vector.multi_reduction <add>, %17, %cst_12 [1] : vector<8x128xf32> to vector<8xf32>
    %19 = vector.shape_cast %18 : vector<8xf32> to vector<8x1xf32>
    %20 = math.log %19 : vector<8x1xf32>
    %21 = vector.broadcast %20 : vector<8x1xf32> to vector<8x128xf32>
    %22 = arith.subf %16, %21 : vector<8x128xf32>
    %23 = tpu.transpose %22, [1, 0] : vector<8x128xf32> -> vector<128x8xf32>
    %24 = vector.extract_strided_slice %23 {offsets = [0, 0], sizes = [16, 8], strides = [1, 1]} : vector<128x8xf32> to vector<16x8xf32>
    %c0_13 = arith.constant 0 : index
    %c0_14 = arith.constant 0 : index
    %25 = vector.load %arg6[%c0_13, %c0_14] : memref<16x8xf32, #tpu.memory_space<vmem>>, vector<16x8xf32>
    tpu.vector_store %arg6[%c0_13, %c0_14], %24 {strides = array<i32>} : memref<16x8xf32, #tpu.memory_space<vmem>>, vector<16x8xf32>,
    return
  }
  func.func @transform_0(%arg0: i32) -> (i32, i32) {
    %c0_i32 = arith.constant 0 : i32
    %c0_i32_0 = arith.constant 0 : i32
    return %arg0, %c0_i32 : i32, i32
  }
  func.func @transform_1(%arg0: i32) -> (i32, i32) {
    %c0_i32 = arith.constant 0 : i32
    %c0_i32_0 = arith.constant 0 : i32
    %c0_i32_1 = arith.constant 0 : i32
    return %c0_i32, %c0_i32_0 : i32, i32
  }
  func.func @transform_2(%arg0: i32) -> (i32, i32) {
    %c0_i32 = arith.constant 0 : i32
    %c0_i32_0 = arith.constant 0 : i32
    %c0_i32_1 = arith.constant 0 : i32
    return %c0_i32, %c0_i32_0 : i32, i32
  }
  func.func @transform_3(%arg0: i32) -> (i32, i32) {
    %c0_i32 = arith.constant 0 : i32
    %c0_i32_0 = arith.constant 0 : i32
    %c0_i32_1 = arith.constant 0 : i32
    return %c0_i32, %c0_i32_0 : i32, i32
  }
  func.func @transform_4(%arg0: i32) -> (i32, i32) {
    %c0_i32 = arith.constant 0 : i32
    %c0_i32_0 = arith.constant 0 : i32
    %c0_i32_1 = arith.constant 0 : i32
    return %c0_i32, %c0_i32_0 : i32, i32
  }
  func.func @transform_5(%arg0: i32) -> (i32, i32) {
    %c0_i32 = arith.constant 0 : i32
    %c0_i32_0 = arith.constant 0 : i32
    return %c0_i32, %arg0 : i32, i32
  }
}

</mosaic_0001>

<bundles_post_ra>
// kernel: simple_model_forward.1
= control target key start
LH: loop header
LB: loop body
LE: loop exit
PB: predicated region body
PF: predicated region fallthrough
CT: control target
= control target key end

     0   :  { %10 = vsyncpa [#allocation3], 0  ;;  %s366_s18 = smov [#allocation2]   ;;  %s453_s0 = inlined_call_operand.vmem [shape: f32[8,32], index: 0, kind: input, shape index: {}]   ;;  %s454_s1 = inlined_call_operand.vmem [shape: f32[32,128], index: 1, kind: input, shape index: {}]   ;;  %s455_s2 = inlined_call_operand.vmem [shape: f32[1,128], index: 2, kind: input, shape index: {}]   ;;  %s456_s3 = inlined_call_operand.hbm [shape: f32[128,128], index: 3, kind: input, shape index: {}]   ;;  %s457_s4 = inlined_call_operand.vmem [shape: f32[1,128], index: 4, kind: input, shape index: {}]   ;;  %s458_s5 = inlined_call_operand.vmem [shape: f32[16,8], index: 5, kind: output, shape index: {}]  }
   0x1   :  { %s22_s19 = sshll.u32 %s366_s18, 4  ;;  %s23_s19 = int_to_ptr.vmem [resolvable:$true] %s22_s19 }
   0x2   :  { %s352_s20 = scalar_lea.vmem %s23_s19, 2048  ;;  %p357_p1 = scmp.lt.s32.totalorder %s23_s19, %s23_s19 }
   0x3   :  { %p353_p0 = scmp.ne.s32.totalorder %s23_s19, %s352_s20  ;;  %p358_p2 = scmp.lt.s32.totalorder %s352_s20, %s352_s20 }
   0x5   :  { %p359_p3 = por %p358_p2, %p357_p1 }
   0x7   :  { %p360_p4 = pnand %p359_p3, %p353_p0 }
   0x9   :  { %363 = shalt.err (!%p360_p4)
}
   0xa   :  { %s367_s21 = smov 128   ;;  %s368_s22 = smov 8  }
   0xb   :  { %28 = dma.hbm_to_vmem [thread:$0]  %s456_s3, 2048, %s23_s19, [#allocation3], %s367_s21, %s367_s21, %s368_s22  }
   0xc   :  { %364 = dma.done.wait [#allocation3], 2048  }
   0xd   :  { %365 = vsyncadd [#allocation3], 4294965248  ;;  %v369_v0 = vmov 0.0   ;;  %vm370_vm0 = vmmov 0   ;;  %v38_v1 = vld [vmem:[%s454_s1 + $0x18] sm:$0xff]  ;;  %v37_v2 = vld [vmem:[%s454_s1 + $0x10] sm:$0xff] }
   0xe   :  { %289 = vmatprep.subr.mxu0 %v369_v0  ;;  %297 = vmatprep.mubr.msk.f32.mxu0 %vm370_vm0, %v369_v0  ;;  %v136_v3 = vld [vmem:[#allocation2 + $0x78] sm:$0xff]  ;;  %v36_v4 = vld [vmem:[%s454_s1 + $0x8] sm:$0xff]  ;;  %v135_v5 = vld [vmem:[#allocation2 + $0x70] sm:$0xff]  ;;  %vm46_vm1 = vcmask 261120   ;;  %vm256_vm2 = vcmask 64512  }
   0xf   :  { %300 = vmatprep.subr.mxu1 %v369_v0  ;;  %332 = vmatprep.mubr.msk.f32.mxu1 %vm370_vm0, %v369_v0  ;;  %v134_v6 = vld [vmem:[#allocation2 + $0x68] sm:$0xff]  ;;  %v35_v7 = vld [vmem:[%s454_s1] sm:$0xff]  ;;  %v132_v10 = vld [vmem:[#allocation2 + $0x58] sm:$0xff] }
  0x10   :  { %290 = vmatpush3.msra.mxu0 %v38_v1  ;;  %301 = vmatpush3.msra.mxu1 %v136_v3  ;;  %v34_v8 = vld [vmem:[%s453_s0] sm:$0xff]  ;;  %v131_v11 = vld [vmem:[#allocation2 + $0x50] sm:$0xff]  ;;  %v130_v12 = vld [vmem:[#allocation2 + $0x48] sm:$0xff] }
  0x11   :  { %291 = vmatprep.subr.mxu0 %v369_v0  ;;  %302 = vmatprep.subr.mxu1 %v369_v0  ;;  %v133_v9 = vld [vmem:[#allocation2 + $0x60] sm:$0xff]  ;;  %v128_v14 = vld [vmem:[#allocation2 + $0x38] sm:$0xff]  ;;  %v127_v15 = vld [vmem:[#allocation2 + $0x30] sm:$0xff] }
  0x12   :  { %292 = vmatpush3.msra.mxu0 %v37_v2  ;;  %303 = vmatpush3.msra.mxu1 %v135_v5  ;;  %v129_v13 = vld [vmem:[#allocation2 + $0x40] sm:$0xff]  ;;  %v126_v16 = vld [vmem:[#allocation2 + $0x28] sm:$0xff]  ;;  %v124_v18 = vld [vmem:[#allocation2 + $0x18] sm:$0xff] }
  0x13   :  { %293 = vmatprep.subr.mxu0 %v369_v0  ;;  %304 = vmatprep.subr.mxu1 %v369_v0  ;;  %v125_v17 = vld [vmem:[#allocation2 + $0x20] sm:$0xff]  ;;  %v123_v19 = vld [vmem:[#allocation2 + $0x10] sm:$0xff]  ;;  %v122_v20 = vld [vmem:[#allocation2 + $0x8] sm:$0xff] }
  0x14   :  { %294 = vmatpush3.msra.mxu0 %v36_v4  ;;  %305 = vmatpush3.msra.mxu1 %v134_v6  ;;  %v121_v21 = vld [vmem:[#allocation2] sm:$0xff] }
  0x15   :  { %295 = vmatprep.subr.mxu0 %v369_v0  ;;  %306 = vmatprep.subr.mxu1 %v369_v0  ;;  %v264_v22 = vld [vmem:[%s455_s2] ss:$0 sm:$0xff] }
  0x16   :  { %296 = vmatpush3.msra.mxu0 %v35_v7  ;;  %307 = vmatpush3.msra.mxu1 %v133_v9  ;;  %v266_v27 = vld [vmem:[%s457_s4] ss:$0 sm:$0xff] }
  0x17   :  { %298 = vmatmul.mubr.msk.f32.vlgmr.msra.gmra.mxu0 %vm46_vm1, %v34_v8  ;;  %308 = vmatprep.subr.mxu1 %v369_v0 }
  0x18   :  { %309 = vmatpush3.msra.mxu1 %v132_v10 }
  0x19   :  { %310 = vmatprep.subr.mxu1 %v369_v0 }
  0x1a   :  { %311 = vmatpush3.msra.mxu1 %v131_v11 }
  0x1b   :  { %312 = vmatprep.subr.mxu1 %v369_v0 }
  0x1c   :  { %313 = vmatpush3.msra.mxu1 %v130_v12 }
  0x1d   :  { %314 = vmatprep.subr.mxu1 %v369_v0 }
  0x1e   :  { %315 = vmatpush3.msra.mxu1 %v129_v13 }
  0x1f   :  { %316 = vmatprep.subr.mxu1 %v369_v0 }
  0x20   :  { %317 = vmatpush3.msra.mxu1 %v128_v14 }
  0x21   :  { %318 = vmatprep.subr.mxu1 %v369_v0 }
  0x22   :  { %319 = vmatpush3.msra.mxu1 %v127_v15 }
  0x23   :  { %320 = vmatprep.subr.mxu1 %v369_v0 }
  0x24   :  { %321 = vmatpush3.msra.mxu1 %v126_v16 }
  0x25   :  { %322 = vmatprep.subr.mxu1 %v369_v0 }
  0x26   :  { %323 = vmatpush3.msra.mxu1 %v125_v17 }
  0x27   :  { %324 = vmatprep.subr.mxu1 %v369_v0 }
  0x28   :  { %325 = vmatpush3.msra.mxu1 %v124_v18 }
  0x29   :  { %326 = vmatprep.subr.mxu1 %v369_v0 }
  0x2a   :  { %327 = vmatpush3.msra.mxu1 %v123_v19 }
  0x2b   :  { %328 = vmatprep.subr.mxu1 %v369_v0 }
  0x2c   :  { %329 = vmatpush3.msra.mxu1 %v122_v20 }
  0x2d   :  { %330 = vmatprep.subr.mxu1 %v369_v0 }
  0x2e   :  { %331 = vmatpush3.msra.mxu1 %v121_v21 }
  0xd7   :  { %v116_v23 = vpop.f32.mrf.mxu0 }
  0xd8   :  { %v117_v24 = vadd.f32 %v264_v22, %v116_v23 }
  0xd9   :  { %v299_v25 = vpop.f32.mrf.mxu0 }
  0xda   :  { %v120_v26 = vmax.f32 %v117_v24, 0.0 }
  0xdc   :  { %333 = vmatmul.mubr.f32.vlgmr.msra.gmra.mxu1 %v120_v26 }
 0x19c   :  { %v210_v28 = vpop.f32.mrf.mxu1 }
 0x19d   :  { %v211_v29 = vadd.f32 %v266_v27, %v210_v28 }
 0x19e   :  { %v334_v30 = vpop.f32.mrf.mxu1 }
 0x19f   :  { %214 = vmax.xlane.f32.xlu0 %v211_v29 }
 0x228   :  { %v215_v31 = vpop.xlane.xlu0 %214 }
 0x229   :  { %v216_v32 = vsub.f32 %v211_v29, %v215_v31 }
 0x22b   :  { %v217_v33 = vmul.f32 1.442695, %v216_v32 }
 0x22d   :  { %340 = vpow2.f32 %v217_v33 }
 0x23a   :  { %v341_v34 = vpop.eup %340 }
 0x23b   :  { %219 = vadd.xlane.f32.xlu0 %v341_v34 }
 0x2c4   :  { %v220_v35 = vpop.xlane.xlu0 %219 }
 0x2c5   :  { %342 = vlog2.f32 %v220_v35 }
 0x2d2   :  { %v343_v36 = vpop.eup %342 }
 0x2d3   :  { %v222_v37 = vmul.f32 0.6931472, %v343_v36 }
 0x2d5   :  { %v223_v38 = vsub.f32 %v216_v32, %v222_v37 }
 0x2d7   :  { %224 = vxpose.xlu1.b32.start.end [1/1] (short) (narrow) %v223_v38, 16 }
 0x353   :  { %v240_v39 = vpop.trf.xlu1 }
 0x354   :  { %257 = vst.msk [vmem:[%s458_s5] sm:$0xff] %vm256_vm2, %v240_v39 }
 0x357   :  { %v241_v40 = vpop.trf.xlu1 }
 0x358   :  { %258 = vst.msk [vmem:[%s458_s5 + $0x8] sm:$0xff] %vm256_vm2, %v241_v40 }
 0x359   :  { %263 = vsyncpa [#allocation3], 1 }

</bundles_post_ra>
